<compile_context>
chip_gen: v7x
topology: tpu7x:2x2x1
jax: 0.10.0
libtpu: 0.0.40
codegen_flags: <defaults>
</compile_context>

<pallas_src>
import jax
import jax.numpy as jnp
from jax import lax
from jax.experimental import pallas as pl
from jax.experimental.pallas import tpu as pltpu


def add_prompt_kernel(x_ref, prompt_ref, o_ref):
    # x_ref, prompt_ref, o_ref: VMEM (TB, CHW_TILE) tiles.
    # Exact-shape VPU add, one lane-dense (unmasked) store per grid step.
    o_ref[...] = x_ref[...] + prompt_ref[...]


def _vmem_budget_bytes():
    # Generation-aware VMEM limit: ~48 MiB on v7x (64 MiB physical),
    # ~96 MiB on v5e/v6e (128 MiB physical).  Conservative fallback if the
    # query is unavailable.
    try:
        cap = pltpu.get_tpu_info().vmem_capacity_bytes or (64 << 20)
    except Exception:
        cap = 64 << 20
    return (cap * 3) // 4


def _choose_tiles(batch, chw, itemsize, vmem_limit):
    """Pick (batch_tile, chw_tile).

    Budget: ~7 tile-sized VMEM buffers (x: 2, out: 2, prompt: <=2, headroom),
    blocks stay (sublane, 128)-aligned, and the batch tile is capped so there
    are enough grid steps for per-core pipelining / v7x megacore sharding.
    """
    sub = max(8, 32 // itemsize)                 # 8 f32 / 16 bf16 / 32 int8
    target = max(256 << 10, vmem_limit // 7)     # bytes per tile buffer
    row_bytes = chw * itemsize

    if sub * row_bytes > target and chw > 128:
        # Large image: a sublane-tile of full-CHW rows doesn't fit the budget.
        # Tile the flattened CHW axis with a lane-dense block instead.
        tb = batch if batch < sub else sub
        max_lanes = target // (tb * itemsize)
        chw_tile = max(128, (max_lanes // 128) * 128)
        if chw_tile >= chw:
            chw_tile = chw
        return tb, chw_tile

    # Small/medium image: full-CHW rows, tile over batch only.
    tb = min(batch, max(1, target // row_bytes))
    if tb < batch:
        tb = batch if batch < sub else max(sub, (tb // sub) * sub)
    if batch >= 2 * sub:
        # Aim for >= 8 grid steps total (>= 4 per TensorCore on v7x).
        steps = min(8, batch // sub)
        cap_tb = -(-batch // steps)              # ceil(batch / steps)
        cap_tb = max(sub, -(-cap_tb // sub) * sub)
        tb = min(tb, cap_tb)
    return tb, chw


def random_patch_prompt(x, patch, offsets):
    """x: (B, C, H, W); patch: (C, P, P); offsets: (2,) int32 = (row, col)."""
    B, C, H, W = x.shape
    chw = C * H * W
    itemsize = jnp.dtype(x.dtype).itemsize

    # Batch-invariant prompt plane, built once in the wrapper (hoisted out of
    # the per-batch grid loop).
    prompt = jnp.zeros((C, H, W), x.dtype)
    prompt = lax.dynamic_update_slice(
        prompt, patch.astype(x.dtype), (jnp.int32(0), offsets[0], offsets[1]))

    vmem_limit = _vmem_budget_bytes()
    tb, chw_tile = _choose_tiles(B, chw, itemsize, vmem_limit)

    xf = x.reshape(B, chw)                       # lane-dense flattened layout
    # Pre-tile the prompt to the batch-tile rows: the kernel add becomes an
    # exact-shape VPU add (no per-step sublane broadcast), and because the
    # prompt's block index only depends on the CHW tile it is fetched only
    # when the (outer) CHW block changes.
    pf = jnp.broadcast_to(prompt.reshape(1, chw), (tb, chw))

    grid = (pl.cdiv(chw, chw_tile), pl.cdiv(B, tb))   # batch = fastest axis

    out = pl.pallas_call(
        add_prompt_kernel,
        out_shape=jax.ShapeDtypeStruct((B, chw), x.dtype),
        grid_spec=pltpu.PrefetchScalarGridSpec(
            num_scalar_prefetch=0,
            grid=grid,
            in_specs=[
                pl.BlockSpec((tb, chw_tile), lambda c, b: (b, c)),
                # Prompt: constant along the inner batch axis -> resident in
                # VMEM across batch steps; single-buffered to save VMEM.
                pl.BlockSpec((tb, chw_tile), lambda c, b: (0, c),
                             pipeline_mode=pl.Buffered(1)),
            ],
            out_specs=pl.BlockSpec((tb, chw_tile), lambda c, b: (b, c)),
        ),
        compiler_params=pltpu.CompilerParams(
            dimension_semantics=("parallel", "parallel"),
            vmem_limit_bytes=vmem_limit,
        ),
        cost_estimate=pl.CostEstimate(
            flops=B * chw,
            transcendentals=0,
            bytes_accessed=(2 * B + tb) * chw * itemsize),
    )(xf, pf)
    return out.reshape(B, C, H, W)

# TODO(synk): the only order-of-magnitude lever left is donating x
# (input_output_aliases={0: 0}) and read-modify-writing only the lane-aligned
# window of rows covering the patch (offsets via scalar prefetch), cutting HBM
# traffic ~H/P x; skipped because it overwrites x, changing caller-visible
# semantics vs the PyTorch module.


if __name__ == "__main__":
    image_size = 16    # args.image_size
    prompt_size = 4    # args.prompt_size
    batch = 2

    key = jax.random.PRNGKey(0)
    k_x, k_patch, k_off = jax.random.split(key, 3)

    # Deterministic "parameters" and inputs (synthetic; no checkpoint load).
    x = jax.random.normal(k_x, (batch, 3, image_size, image_size), jnp.float32)
    patch = jax.random.normal(
        k_patch, (1, 3, prompt_size, prompt_size), jnp.float32)

    # PyTorch draws np.random.choice(isize - psize) twice on the host;
    # emulate that with jax.random and pass the offsets in.
    offsets = jax.random.randint(
        k_off, (2,), 0, image_size - prompt_size, jnp.int32)

    fwd = jax.jit(random_patch_prompt)
    out = jax.block_until_ready(fwd(x, patch[0], offsets))

    # Reference (pure JAX), mirroring the PyTorch forward exactly.
    xo, yo = int(offsets[0]), int(offsets[1])
    prompt_full = jnp.zeros((1, 3, image_size, image_size), jnp.float32)
    prompt_full = prompt_full.at[:, :, xo:xo + prompt_size,
                                 yo:yo + prompt_size].set(patch)
    ref = x + prompt_full

    assert out.shape == x.shape and out.dtype == x.dtype
    assert jnp.allclose(out, ref, atol=1e-6), "mismatch vs reference"
    print("KERNEL_OK")
</pallas_src>

<mosaic_0001>
module attributes {stable_mosaic.version = 11 : i64} {
  func.func @add_prompt_kernel(%arg0: i32, %arg1: i32, %arg2: memref<2x768xf32, #tpu.memory_space<vmem>>, %arg3: memref<2x768xf32, #tpu.memory_space<vmem>>, %arg4: memref<2x768xf32, #tpu.memory_space<vmem>>) attributes {dimension_semantics = [#tpu.dimension_semantics<parallel>, #tpu.dimension_semantics<parallel>], iteration_bounds = array<i64: 1, 1>, scalar_prefetch = 0 : i64, scratch_operands = 0 : i64, tpu.core_type = #tpu.core_type<tc>, window_params = [{transform_indices = @transform_0, window_bounds = array<i64: 2, 768>}, {pipeline_mode = #tpu.pipeline_mode<synchronous>, transform_indices = @transform_1, window_bounds = array<i64: 2, 768>}, {transform_indices = @transform_2, window_bounds = array<i64: 2, 768>}]} {
    %c0 = arith.constant 0 : index
    %c0_0 = arith.constant 0 : index
    %0 = vector.load %arg2[%c0, %c0_0] : memref<2x768xf32, #tpu.memory_space<vmem>>, vector<2x768xf32>
    %c0_1 = arith.constant 0 : index
    %c0_2 = arith.constant 0 : index
    %1 = vector.load %arg3[%c0_1, %c0_2] : memref<2x768xf32, #tpu.memory_space<vmem>>, vector<2x768xf32>
    %2 = arith.addf %0, %1 : vector<2x768xf32>
    %c0_3 = arith.constant 0 : index
    %c0_4 = arith.constant 0 : index
    %3 = vector.load %arg4[%c0_3, %c0_4] : memref<2x768xf32, #tpu.memory_space<vmem>>, vector<2x768xf32>
    tpu.vector_store %arg4[%c0_3, %c0_4], %2 {strides = array<i32>} : memref<2x768xf32, #tpu.memory_space<vmem>>, vector<2x768xf32>,
    return
  }
  func.func @transform_0(%arg0: i32, %arg1: i32) -> (i32, i32) {
    %c0_i32 = arith.constant 0 : i32
    return %arg1, %arg0 : i32, i32
  }
  func.func @transform_1(%arg0: i32, %arg1: i32) -> (i32, i32) {
    %c0_i32 = arith.constant 0 : i32
    %c0_i32_0 = arith.constant 0 : i32
    return %c0_i32, %arg0 : i32, i32
  }
  func.func @transform_2(%arg0: i32, %arg1: i32) -> (i32, i32) {
    %c0_i32 = arith.constant 0 : i32
    return %arg1, %arg0 : i32, i32
  }
}

</mosaic_0001>

<bundles_post_ra>
// kernel: random_patch_prompt.1
= control target key start
LH: loop header
LB: loop body
LE: loop exit
PB: predicated region body
PF: predicated region fallthrough
CT: control target
= control target key end

     0   :  { %s56_s0 = inlined_call_operand.vmem [shape: f32[2,768], index: 0, kind: input, shape index: {}]   ;;  %s57_s1 = inlined_call_operand.vmem [shape: f32[2,768], index: 1, kind: input, shape index: {}]   ;;  %s58_s2 = inlined_call_operand.vmem [shape: f32[2,768], index: 2, kind: output, shape index: {}]  }
   0x1   :  { %v11_v0 = vld [vmem:[%s56_s0] sm:$0xff]  ;;  %v12_v2 = vld [vmem:[%s56_s0 + $0x8] sm:$0xf] }
   0x2   :  { %v13_v1 = vld [vmem:[%s57_s1] sm:$0xff]  ;;  %v14_v4 = vld [vmem:[%s57_s1 + $0x8] sm:$0xf] }
   0x3   :  { %v15_v3 = vadd.f32 %v13_v1, %v11_v0  ;;  %v16_v5 = vadd.f32 %v14_v4, %v12_v2 }
   0x5   :  { %17 = vst [vmem:[%s58_s2] sm:$0xff] %v15_v3  ;;  %18 = vst [vmem:[%s58_s2 + $0x8] sm:$0xf] %v16_v5 }

</bundles_post_ra>
